<compile_context>
chip_gen: v6e
topology: v6e:2x2x1
jax: 0.10.0
libtpu: 0.0.40
codegen_flags: <defaults>
</compile_context>

<pallas_src>
import functools

import jax
import jax.numpy as jnp
from jax.experimental import pallas as pl
from jax.experimental.pallas import tpu as pltpu

_LANES = 128            # TPU lane width: batch tiles are multiples of this.
_MAX_BATCH_TILE = 2048  # per-step VMEM at this cap is well under 1 MiB.


def critic_kernel(x_ref, w1t_ref, b1_ref, w2t_ref, b2_ref, w3t_ref, out_ref):
    """Feature-major MLP: x is (in_dim, tb); weights are pre-transposed."""
    # Layer 1: (H, in_dim) @ (in_dim, tb) -> (H, tb); bias broadcast over lanes.
    h1 = jnp.dot(w1t_ref[...], x_ref[...],
                 preferred_element_type=jnp.float32) + b1_ref[...]
    h1 = jnp.maximum(h1, 0.0)

    # Layer 2: (H, H) @ (H, tb) -> (H, tb).
    h2 = jnp.dot(w2t_ref[...], h1.astype(w2t_ref.dtype),
                 preferred_element_type=jnp.float32) + b2_ref[...]
    h2 = jnp.maximum(h2, 0.0)

    # Output head: (1, H) @ (H, tb) -> (1, tb).  Lane-dense store; the final
    # scalar bias is folded in by the wrapper.
    out_ref[...] = jnp.dot(w3t_ref[...], h2.astype(w3t_ref.dtype),
                           preferred_element_type=jnp.float32
                           ).astype(out_ref.dtype)


def _round_up(n, m):
    return -(-n // m) * m


def _pick_batch_tile(batch):
    """Lane-aligned batch tile.

    Small batches get a single 128/256-lane padded tile; larger batches get a
    tile chosen so the grid has >= 2 steps (v7x dual-TC sharding), capped at
    _MAX_BATCH_TILE to keep per-step overhead amortized without huge VMEM.
    """
    if batch <= _LANES:
        return _LANES
    if batch <= 2 * _LANES:
        return 2 * _LANES
    half = _round_up(_round_up(batch, 2) // 2, _LANES)
    return min(_MAX_BATCH_TILE, half)


@functools.partial(jax.jit, static_argnames=("block_batch", "use_bf16"))
def critic_forward(states, actions, params, *, block_batch=None, use_bf16=False):
    """Pallas-backed Critic forward.  states: (B, S), actions: (B, A) -> (B, 1)."""
    (w1, b1), (w2, b2), (w3, b3) = params
    batch = states.shape[0]
    in_dim, hidden = w1.shape           # (S + A, H)

    op_dtype = jnp.bfloat16 if use_bf16 else jnp.float32

    # Feature-major input: concat + transpose fuse into one XLA copy.
    x = jnp.concatenate(
        [states.astype(jnp.float32).T, actions.astype(jnp.float32).T],
        axis=0).astype(op_dtype)

    # Batch tiling: lane-aligned tile; ragged batch is padded up, never the
    # tile shrunk down to a sliver.
    if block_batch is not None:
        tb = _round_up(block_batch, _LANES)
    else:
        tb = _pick_batch_tile(batch)
    padded = _round_up(batch, tb)
    if padded != batch:
        x = jnp.pad(x, ((0, 0), (0, padded - batch)))
    grid = (padded // tb,)

    resident = lambda i: (0, 0)   # weights/biases: VMEM-resident across steps
    tiled = lambda i: (0, i)      # activations/output: march along batch (lanes)

    out_row = pl.pallas_call(
        critic_kernel,
        out_shape=jax.ShapeDtypeStruct((1, padded), jnp.float32),
        grid=grid,
        in_specs=[
            pl.BlockSpec((in_dim, tb), tiled),
            pl.BlockSpec((hidden, in_dim), resident),
            pl.BlockSpec((hidden, 1), resident),
            pl.BlockSpec((hidden, hidden), resident),
            pl.BlockSpec((hidden, 1), resident),
            pl.BlockSpec((1, hidden), resident),
        ],
        out_specs=pl.BlockSpec((1, tb), tiled),
        compiler_params=pltpu.CompilerParams(
            dimension_semantics=("parallel",)),
    )(x,
      w1.T.astype(op_dtype), b1.reshape(hidden, 1).astype(jnp.float32),
      w2.T.astype(op_dtype), b2.reshape(hidden, 1).astype(jnp.float32),
      w3.T.astype(op_dtype))

    # Un-pad, restore (B, 1) shape, and fold in the final bias here (cheaper
    # than shipping a (1, 1) tile into the kernel).
    return out_row[0, :batch].reshape(batch, 1) + b3.astype(jnp.float32)


def init_linear(key, fan_in, fan_out):
    """Deterministic PyTorch-style uniform(-1/sqrt(fan_in), 1/sqrt(fan_in)) init."""
    kw, kb = jax.random.split(key)
    bound = 1.0 / jnp.sqrt(fan_in)
    w = jax.random.uniform(kw, (fan_in, fan_out), jnp.float32, -bound, bound)
    b = jax.random.uniform(kb, (fan_out,), jnp.float32, -bound, bound)
    return w, b


def critic_reference(states, actions, params):
    """Pure-JAX reference matching the PyTorch forward exactly."""
    (w1, b1), (w2, b2), (w3, b3) = params
    x = jnp.concatenate([states, actions], axis=1)
    x = jnp.maximum(x @ w1 + b1, 0.0)
    x = jnp.maximum(x @ w2 + b2, 0.0)
    return x @ w3 + b3


if __name__ == "__main__":
    # sizes = [state_dim + action_dim, H, H, 1]  (Linear+ReLU, Linear+ReLU, Linear)
    state_dim, action_dim, hidden = 8, 4, 32

    key = jax.random.PRNGKey(0)
    k_s, k_a, k1, k2, k3 = jax.random.split(key, 5)

    params = [
        init_linear(k1, state_dim + action_dim, hidden),  # Linear + ReLU
        init_linear(k2, hidden, hidden),                  # Linear + ReLU
        init_linear(k3, hidden, 1),                       # output Linear
    ]

    # Check 1: tiny batch (padded to a single 128-lane tile, 1 grid step).
    batch = 2
    states = jax.random.normal(k_s, (batch, state_dim), jnp.float32)
    actions = jax.random.normal(k_a, (batch, action_dim), jnp.float32)
    out = jax.block_until_ready(critic_forward(states, actions, params))
    ref = critic_reference(states, actions, params)
    assert out.shape == (batch, 1), out.shape
    assert jnp.allclose(out, ref, atol=1e-5, rtol=1e-5), (out, ref)

    # Check 2: ragged batch -> padded to 2 x 256-lane tiles (exercises the
    # multi-step "parallel" grid and the pad/unpad path).
    batch2 = 300
    states2 = jax.random.normal(k_s, (batch2, state_dim), jnp.float32)
    actions2 = jax.random.normal(k_a, (batch2, action_dim), jnp.float32)
    out2 = jax.block_until_ready(critic_forward(states2, actions2, params))
    ref2 = critic_reference(states2, actions2, params)
    assert out2.shape == (batch2, 1), out2.shape
    assert jnp.allclose(out2, ref2, atol=1e-5, rtol=1e-5)

    # Check 3: optional bf16 operand stream (f32 accumulation) — loose tolerance.
    out3 = jax.block_until_ready(
        critic_forward(states2, actions2, params, use_bf16=True))
    assert out3.shape == (batch2, 1), out3.shape
    assert jnp.allclose(out3, ref2, atol=5e-2, rtol=5e-2)

    print("KERNEL_OK")
</pallas_src>

<mosaic_0001>
module attributes {stable_mosaic.version = 11 : i64} {
  func.func @critic_kernel(%arg0: i32, %arg1: memref<12x128xf32, #tpu.memory_space<vmem>>, %arg2: memref<32x12xf32, #tpu.memory_space<vmem>>, %arg3: memref<32x1xf32, #tpu.memory_space<vmem>>, %arg4: memref<32x32xf32, #tpu.memory_space<vmem>>, %arg5: memref<32x1xf32, #tpu.memory_space<vmem>>, %arg6: memref<1x32xf32, #tpu.memory_space<vmem>>, %arg7: memref<1x128xf32, #tpu.memory_space<vmem>>) attributes {dimension_semantics = [#tpu.dimension_semantics<parallel>], iteration_bounds = array<i64: 1>, scalar_prefetch = 0 : i64, scratch_operands = 0 : i64, tpu.core_type = #tpu.core_type<tc>, window_params = [{transform_indices = @transform_0, window_bounds = array<i64: 12, 128>}, {pipeline_mode = #tpu.pipeline_mode<synchronous>, transform_indices = @transform_1, window_bounds = array<i64: 32, 12>}, {pipeline_mode = #tpu.pipeline_mode<synchronous>, transform_indices = @transform_2, window_bounds = array<i64: 32, 1>}, {pipeline_mode = #tpu.pipeline_mode<synchronous>, transform_indices = @transform_3, window_bounds = array<i64: 32, 32>}, {pipeline_mode = #tpu.pipeline_mode<synchronous>, transform_indices = @transform_4, window_bounds = array<i64: 32, 1>}, {pipeline_mode = #tpu.pipeline_mode<synchronous>, transform_indices = @transform_5, window_bounds = array<i64: 1, 32>}, {transform_indices = @transform_6, window_bounds = array<i64: 1, 128>}]} {
    %c0 = arith.constant 0 : index
    %c0_0 = arith.constant 0 : index
    %0 = vector.load %arg2[%c0, %c0_0] : memref<32x12xf32, #tpu.memory_space<vmem>>, vector<32x12xf32>
    %c0_1 = arith.constant 0 : index
    %c0_2 = arith.constant 0 : index
    %1 = vector.load %arg1[%c0_1, %c0_2] : memref<12x128xf32, #tpu.memory_space<vmem>>, vector<12x128xf32>
    %cst = arith.constant dense<0.000000e+00> : vector<32x128xf32>
    %2 = tpu.matmul %0, %1, %cst {dimension_numbers = #tpu.dot_dimension_numbers<[1], [0], [0], [1], [0, 0, 1, 1], [], []>} : vector<32x12xf32>, vector<12x128xf32>, vector<32x128xf32> -> vector<32x128xf32>
    %c0_3 = arith.constant 0 : index
    %c0_4 = arith.constant 0 : index
    %3 = vector.load %arg3[%c0_3, %c0_4] : memref<32x1xf32, #tpu.memory_space<vmem>>, vector<32x1xf32>
    %4 = vector.broadcast %3 : vector<32x1xf32> to vector<32x128xf32>
    %5 = arith.addf %2, %4 : vector<32x128xf32>
    %cst_5 = arith.constant 0.000000e+00 : f32
    %6 = vector.broadcast %cst_5 : f32 to vector<32x128xf32>
    %7 = arith.maximumf %5, %6 : vector<32x128xf32>
    %c0_6 = arith.constant 0 : index
    %c0_7 = arith.constant 0 : index
    %8 = vector.load %arg4[%c0_6, %c0_7] : memref<32x32xf32, #tpu.memory_space<vmem>>, vector<32x32xf32>
    %cst_8 = arith.constant dense<0.000000e+00> : vector<32x128xf32>
    %9 = tpu.matmul %8, %7, %cst_8 {dimension_numbers = #tpu.dot_dimension_numbers<[1], [0], [0], [1], [0, 0, 1, 1], [], []>} : vector<32x32xf32>, vector<32x128xf32>, vector<32x128xf32> -> vector<32x128xf32>
    %c0_9 = arith.constant 0 : index
    %c0_10 = arith.constant 0 : index
    %10 = vector.load %arg5[%c0_9, %c0_10] : memref<32x1xf32, #tpu.memory_space<vmem>>, vector<32x1xf32>
    %11 = vector.broadcast %10 : vector<32x1xf32> to vector<32x128xf32>
    %12 = arith.addf %9, %11 : vector<32x128xf32>
    %cst_11 = arith.constant 0.000000e+00 : f32
    %13 = vector.broadcast %cst_11 : f32 to vector<32x128xf32>
    %14 = arith.maximumf %12, %13 : vector<32x128xf32>
    %c0_12 = arith.constant 0 : index
    %c0_13 = arith.constant 0 : index
    %15 = vector.load %arg6[%c0_12, %c0_13] : memref<1x32xf32, #tpu.memory_space<vmem>>, vector<1x32xf32>
    %cst_14 = arith.constant dense<0.000000e+00> : vector<1x128xf32>
    %16 = tpu.matmul %15, %14, %cst_14 {dimension_numbers = #tpu.dot_dimension_numbers<[1], [0], [0], [1], [0, 0, 1, 1], [], []>} : vector<1x32xf32>, vector<32x128xf32>, vector<1x128xf32> -> vector<1x128xf32>
    %c0_15 = arith.constant 0 : index
    %c0_16 = arith.constant 0 : index
    %17 = vector.load %arg7[%c0_15, %c0_16] : memref<1x128xf32, #tpu.memory_space<vmem>>, vector<1x128xf32>
    tpu.vector_store %arg7[%c0_15, %c0_16], %16 {strides = array<i32>} : memref<1x128xf32, #tpu.memory_space<vmem>>, vector<1x128xf32>,
    return
  }
  func.func @transform_0(%arg0: i32) -> (i32, i32) {
    %c0_i32 = arith.constant 0 : i32
    %c0_i32_0 = arith.constant 0 : i32
    return %c0_i32, %arg0 : i32, i32
  }
  func.func @transform_1(%arg0: i32) -> (i32, i32) {
    %c0_i32 = arith.constant 0 : i32
    %c0_i32_0 = arith.constant 0 : i32
    %c0_i32_1 = arith.constant 0 : i32
    return %c0_i32, %c0_i32_0 : i32, i32
  }
  func.func @transform_2(%arg0: i32) -> (i32, i32) {
    %c0_i32 = arith.constant 0 : i32
    %c0_i32_0 = arith.constant 0 : i32
    %c0_i32_1 = arith.constant 0 : i32
    return %c0_i32, %c0_i32_0 : i32, i32
  }
  func.func @transform_3(%arg0: i32) -> (i32, i32) {
    %c0_i32 = arith.constant 0 : i32
    %c0_i32_0 = arith.constant 0 : i32
    %c0_i32_1 = arith.constant 0 : i32
    return %c0_i32, %c0_i32_0 : i32, i32
  }
  func.func @transform_4(%arg0: i32) -> (i32, i32) {
    %c0_i32 = arith.constant 0 : i32
    %c0_i32_0 = arith.constant 0 : i32
    %c0_i32_1 = arith.constant 0 : i32
    return %c0_i32, %c0_i32_0 : i32, i32
  }
  func.func @transform_5(%arg0: i32) -> (i32, i32) {
    %c0_i32 = arith.constant 0 : i32
    %c0_i32_0 = arith.constant 0 : i32
    %c0_i32_1 = arith.constant 0 : i32
    return %c0_i32, %c0_i32_0 : i32, i32
  }
  func.func @transform_6(%arg0: i32) -> (i32, i32) {
    %c0_i32 = arith.constant 0 : i32
    %c0_i32_0 = arith.constant 0 : i32
    return %c0_i32, %arg0 : i32, i32
  }
}

</mosaic_0001>

<bundles_post_ra>
// kernel: critic_forward.1
= control target key start
LH: loop header
LB: loop body
LE: loop exit
PB: predicated region body
PF: predicated region fallthrough
CT: control target
= control target key end

     0   :  { %vm66_vm0 = vcmask 1043456   ;;  %vm53_vm1 = vcmask 97280   ;;  %v437_v3 = vmov 0   ;;  %vm187_vm2 = vcmask 261120   ;;  %s544_s0 = inlined_call_operand.vmem [shape: f32[12,128], index: 0, kind: input, shape index: {}]   ;;  %s545_s1 = inlined_call_operand.vmem [shape: f32[32,12], index: 1, kind: input, shape index: {}]   ;;  %s546_s2 = inlined_call_operand.vmem [shape: f32[32,1], index: 2, kind: input, shape index: {}]   ;;  %s547_s4 = inlined_call_operand.vmem [shape: f32[32,1], index: 4, kind: input, shape index: {}]   ;;  %s548_s3 = inlined_call_operand.vmem [shape: f32[32,32], index: 3, kind: input, shape index: {}]   ;;  %s549_s5 = inlined_call_operand.vmem [shape: f32[1,32], index: 5, kind: input, shape index: {}]   ;;  %s550_s6 = inlined_call_operand.vmem [shape: f32[1,128], index: 6, kind: output, shape index: {}]  }
   0x1   :  { %v28_v0 = vld [vmem:[%s544_s0 + $0x8] sm:$0xf]  ;;  %v27_v1 = vld [vmem:[%s544_s0] sm:$0xff]  ;;  %435 = vset.pattern.permute.xlu0 %v437_v3  ;;  %436 = vset.pattern.permute.xlu1 %v437_v3  ;;  %v32_v5 = vld [vmem:[%s546_s2 + $0x18] sm:$0xff]  ;;  %v438_v35 = vmov 0.0   ;;  %vm439_vm3 = vmmov 0  }
   0x2   :  { %v23_v2 = vld [vmem:[%s545_s1] sm:$0xff]  ;;  %397 = vmatprep.subr.msk.mxu0 %vm66_vm0, %v28_v0  ;;  %v24_v4 = vld [vmem:[%s545_s1 + $0x8] sm:$0xff]  ;;  %v25_v7 = vld [vmem:[%s545_s1 + $0x10] sm:$0xff]  ;;  %50 = vperm.xlu0 %435, %v32_v5  }
   0x3   :  { %401 = vmatprep.mubr.msk.f32.mxu0 %vm53_vm1, %v23_v2  ;;  %398 = vmatpush3.msk.msra.mxu0 %vm66_vm0, %v28_v0  ;;  %v30_v6 = vld [vmem:[%s546_s2 + $0x8] sm:$0xff]  ;;  %v31_v8 = vld [vmem:[%s546_s2 + $0x10] sm:$0xff]  ;;  %v29_v9 = vld [vmem:[%s546_s2] sm:$0xff] }
   0x4   :  { %399 = vmatprep.subr.mxu0 %v27_v1  ;;  %40 = vperm.xlu1 %436, %v30_v6   ;;  %v26_v10 = vld [vmem:[%s545_s1 + $0x18] sm:$0xff]  ;;  %v165_v12 = vld [vmem:[%s547_s4 + $0x10] sm:$0xff]  ;;  %v164_v13 = vld [vmem:[%s547_s4 + $0x8] sm:$0xff] }
   0x5   :  { %400 = vmatpush3.msra.mxu0 %v27_v1  ;;  %v166_v11 = vld [vmem:[%s547_s4 + $0x18] sm:$0xff]  ;;  %v163_v14 = vld [vmem:[%s547_s4] sm:$0xff]  ;;  %v160_v32 = vld [vmem:[%s548_s3 + $0x8] sm:$0xff] }
   0x6   :  { %402 = vmatmul.mubr.msk.f32.vlgmr.msra.gmra.mxu0 %vm53_vm1, %v24_v4  ;;  %45 = vperm.xlu0 %435, %v31_v8   ;;  %v159_v15 = vld [vmem:[%s548_s3] sm:$0xff]  ;;  %v161_v33 = vld [vmem:[%s548_s3 + $0x10] sm:$0xff]  ;;  %v162_v34 = vld [vmem:[%s548_s3 + $0x18] sm:$0xff] }
   0x7   :  { %404 = vmatprep.mubr.msk.f32.mxu0 %vm53_vm1, %v25_v7  ;;  %415 = vmatprep.mubr.msk.f32.mxu1 %vm187_vm2, %v159_v15  ;;  %v289_v52 = vld [vmem:[%s549_s5] sm:$0x1] }
   0x8   :  { %35 = vperm.xlu1 %436, %v29_v9   ;;  %421 = vmatprep.subr.mxu0 %v438_v35 }
   0xa   :  { %405 = vmatmul.mubr.msk.f32.gmra.mxu0 %vm53_vm1, %v26_v10  ;;  %184 = vperm.xlu0 %435, %v166_v11  }
   0xb   :  { %429 = vmatprep.mubr.msk.f32.mxu0 %vm439_vm3, %v438_v35 }
   0xc   :  { %179 = vperm.xlu1 %436, %v165_v12  }
   0xe   :  { %174 = vperm.xlu0 %435, %v164_v13  }
  0x10   :  { %169 = vperm.xlu1 %436, %v163_v14  }
  0x7d   :  { %v51_v16 = vpop.permute.xlu0 %50 }
  0x7f   :  { %v41_v18 = vpop.permute.xlu1 %40 }
  0x81   :  { %v46_v22 = vpop.permute.xlu0 %45 }
  0x83   :  { %v36_v27 = vpop.permute.xlu1 %35 }
  0x85   :  { %v185_v36 = vpop.permute.xlu0 %184 }
  0x87   :  { %v180_v38 = vpop.permute.xlu1 %179 }
  0x89   :  { %v175_v42 = vpop.permute.xlu0 %174 }
  0x8b   :  { %v170_v47 = vpop.permute.xlu1 %169 }
  0xc6   :  { %v403_v17 = vpop.f32.mrf.mxu0 }
  0xc7   :  { %v142_v24 = vadd.f32 %v403_v17, %v41_v18 }
  0xc8   :  { %v136_v19 = vpop.f32.mrf.mxu0 }
  0xc9   :  { %v137_v28 = vadd.f32 %v136_v19, %v36_v27  ;;  %v156_v30 = vmax.f32 %v142_v24, 0.0 }
  0xca   :  { %v406_v20 = vpop.f32.mrf.mxu0 }
  0xcb   :  { %v152_v21 = vadd.f32 %v406_v20, %v51_v16  ;;  %v155_v31 = vmax.f32 %v137_v28, 0.0 }
  0xcc   :  { %v146_v23 = vpop.f32.mrf.mxu0 }
  0xcd   :  { %v158_v25 = vmax.f32 %v152_v21, 0.0  ;;  %v147_v26 = vadd.f32 %v146_v23, %v46_v22 }
  0xcf   :  { %v157_v29 = vmax.f32 %v147_v26, 0.0  ;;  %407 = vmatprep.subr.mxu1 %v158_v25 }
  0xd0   :  { %408 = vmatpush3.msra.mxu1 %v158_v25 }
  0xd1   :  { %409 = vmatprep.subr.mxu1 %v157_v29 }
  0xd2   :  { %410 = vmatpush3.msra.mxu1 %v157_v29 }
  0xd3   :  { %411 = vmatprep.subr.mxu1 %v156_v30 }
  0xd4   :  { %412 = vmatpush3.msra.mxu1 %v156_v30 }
  0xd5   :  { %413 = vmatprep.subr.mxu1 %v155_v31 }
  0xd6   :  { %414 = vmatpush3.msra.mxu1 %v155_v31 }
  0xd7   :  { %416 = vmatmul.mubr.msk.f32.vlgmr.msra.gmra.mxu1 %vm187_vm2, %v160_v32 }
  0xd8   :  { %418 = vmatprep.mubr.msk.f32.mxu1 %vm187_vm2, %v161_v33 }
  0xdb   :  { %419 = vmatmul.mubr.msk.f32.gmra.mxu1 %vm187_vm2, %v162_v34 }
 0x197   :  { %v417_v37 = vpop.f32.mrf.mxu1 }
 0x198   :  { %v272_v44 = vadd.f32 %v417_v37, %v175_v42 }
 0x199   :  { %v266_v39 = vpop.f32.mrf.mxu1 }
 0x19a   :  { %v267_v48 = vadd.f32 %v266_v39, %v170_v47  ;;  %v286_v50 = vmax.f32 %v272_v44, 0.0 }
 0x19b   :  { %v420_v40 = vpop.f32.mrf.mxu1 }
 0x19c   :  { %v282_v41 = vadd.f32 %v420_v40, %v185_v36  ;;  %v285_v51 = vmax.f32 %v267_v48, 0.0 }
 0x19d   :  { %v276_v43 = vpop.f32.mrf.mxu1 }
 0x19e   :  { %v288_v45 = vmax.f32 %v282_v41, 0.0  ;;  %v277_v46 = vadd.f32 %v276_v43, %v180_v38 }
 0x1a0   :  { %v287_v49 = vmax.f32 %v277_v46, 0.0  ;;  %422 = vmatpush3.msra.mxu0 %v288_v45 }
 0x1a1   :  { %423 = vmatprep.subr.mxu0 %v438_v35 }
 0x1a2   :  { %424 = vmatpush3.msra.mxu0 %v287_v49 }
 0x1a3   :  { %425 = vmatprep.subr.mxu0 %v438_v35 }
 0x1a4   :  { %426 = vmatpush3.msra.mxu0 %v286_v50 }
 0x1a5   :  { %427 = vmatprep.subr.mxu0 %v438_v35 }
 0x1a6   :  { %428 = vmatpush3.msra.mxu0 %v285_v51 }
 0x1a7   :  { %430 = vmatmul.mubr.msk.f32.vlgmr.msra.gmra.mxu0 %vm187_vm2, %v289_v52 }
 0x267   :  { %v359_v53 = vpop.f32.mrf.mxu0 }
 0x268   :  { %363 = vst [vmem:[%s550_s6] sm:$0x1] %v359_v53 }
 0x269   :  { %v431_v54 = vpop.f32.mrf.mxu0 }

</bundles_post_ra>
